<compile_context>
chip_gen: v7x
topology: tpu7x:2x2x1
jax: 0.10.0
libtpu: 0.0.40
codegen_flags: <defaults>
</compile_context>

<pallas_src>
import math

import jax
import jax.numpy as jnp
from jax import lax
from jax.experimental import pallas as pl
from jax.experimental.pallas import tpu as pltpu


# --------------------------------- kernel -----------------------------------

def _slstm_kernel(
    # row-blocked activations (f32)
    x_ref, h_ref, c_ref, n_ref, m_ref,
    # SMEM scalars
    conv_w_ref, conv_b_ref,
    # resident params
    ln_g_ref, ln_b_ref,
    r_all_ref, b_gate_ref, w_zo_ref, w_if_ref,
    gmat_ref, gn_scale_ref, gn_g_ref, gn_b_ref,
    w_up_ref, b_up_ref, w_down_ref, b_down_ref,
    # single lane-dense packed output [out | h | c | n | m]
    packed_ref,
):
    f32 = jnp.float32
    Din = x_ref.shape[-1]
    Dh = h_ref.shape[-1]
    Dh_p = r_all_ref.shape[-1] // 4          # 128-aligned gate segment width
    proj_p = w_up_ref.shape[-1] // 2         # 128-aligned up-proj segment width
    mm_dtype = w_zo_ref.dtype                # bf16 (or f32) matmul operand dtype

    x = x_ref[...]
    h_prev = h_ref[...]
    c_prev = c_ref[...]
    n_prev = n_ref[...]
    m_prev = m_ref[...]
    rows = x.shape[0]

    # ---- LayerNorm(input_size), eps=1e-5 ----
    mu = jnp.mean(x, axis=-1, keepdims=True)
    xc = x - mu
    var = jnp.mean(xc * xc, axis=-1, keepdims=True)
    x_norm = xc * lax.rsqrt(var + 1e-5) * ln_g_ref[...] + ln_b_ref[...]

    # ---- CausalConv1D (1->1 ch, k=4, left-pad 3) entirely in vregs ----
    # shifted-by-s operand = [0]*s ++ x_norm[:, :Din-s]  (no scratch, no zero-fill).
    conv = conv_b_ref[0] + conv_w_ref[3] * x_norm
    for s, tap in ((1, 2), (2, 1), (3, 0)):
        shifted = jnp.concatenate(
            [jnp.zeros((rows, s), f32), x_norm[:, :Din - s]], axis=-1)
        conv = conv + conv_w_ref[tap] * shifted
    x_conv = conv * jax.nn.sigmoid(conv)     # SiLU

    def mm(a, w_ref):
        return jnp.dot(a.astype(mm_dtype), w_ref[...], preferred_element_type=f32)

    # ---- fused gate projections: 3 wide MXU dots, 128-aligned segments ----
    # r layout: [z | o | i | f], each Dh_p wide, all gate biases folded in.
    r = mm(h_prev, r_all_ref) + b_gate_ref[...]
    zo = mm(x, w_zo_ref) + r[:, :2 * Dh_p]           # [z_pre | o_pre]
    if_ = mm(x_conv, w_if_ref) + r[:, 2 * Dh_p:]     # [i_pre | f_pre]

    z = jnp.tanh(zo[:, :Dh])
    o = jax.nn.sigmoid(zo[:, Dh_p:Dh_p + Dh])
    i_tilde = if_[:, :Dh]
    f_tilde = if_[:, Dh_p:Dh_p + Dh]

    # ---- sLSTM recurrence (f32) ----
    m_t = jnp.maximum(f_tilde + m_prev, i_tilde)
    i_g = jnp.exp(i_tilde - m_t)
    f_g = jnp.exp(f_tilde + m_prev - m_t)
    c_t = f_g * c_prev + i_g * z
    n_t = f_g * n_prev + i_g
    h_t = o * c_t * pl.reciprocal(n_t + 1e-6, approx=True)

    # ---- GroupNorm(num_heads, Dh), eps=1e-5 ----
    # gmat is an exact 0/1 group-indicator in mm_dtype; 1/head applied in f32.
    inv_head = gn_scale_ref[0]
    gmat = gmat_ref[...]
    g_mean = jnp.dot(h_t.astype(gmat.dtype), gmat,
                     preferred_element_type=f32) * inv_head
    diff = h_t - g_mean
    g_var = jnp.dot((diff * diff).astype(gmat.dtype), gmat,
                    preferred_element_type=f32) * inv_head
    h_norm = diff * lax.rsqrt(g_var + 1e-5) * gn_g_ref[...] + gn_b_ref[...]

    # ---- fused up-projection [left|right], exact GELU gate, down proj, residual ----
    up = mm(h_norm, w_up_ref) + b_up_ref[...]
    left = up[:, :proj_p]
    right = up[:, proj_p:]
    gelu_r = 0.5 * right * (1.0 + lax.erf(right * (1.0 / math.sqrt(2.0))))
    # padded lanes of left/right are exactly 0 -> zero contribution through W_down
    out = mm(left * gelu_r, w_down_ref) + b_down_ref[...] + x

    # ---- single lane-dense packed writeback: [out | h | c | n | m] ----
    packed_ref[...] = jnp.concatenate([out, h_t, c_t, n_t, m_t], axis=-1)


# --------------------------------- wrapper ----------------------------------

_WEIGHT_KEYS = ("ln_g", "ln_b", "R_all", "b_gate", "W_zo", "W_if",
                "gmat", "gn_g", "gn_b", "W_up", "b_up", "W_down", "b_down")


def slstm_block_forward(params, x, state, *, block_b=None):
    h_prev, c_prev, n_prev, m_prev = state
    B, Din = x.shape
    Dh = h_prev.shape[-1]
    f32 = jnp.float32
    packed_w = Din + 4 * Dh

    # ---- block_b: >=2 parallel grid steps when possible (v7x 2 TCs), cap 512 ----
    if block_b is None:
        half = -(-B // 2)
        block_b = min(512, ((half + 7) // 8) * 8)
        if block_b >= B:
            block_b = B

    def _vmem_estimate(bb):
        w_bytes = sum(int(params[k].size) * params[k].dtype.itemsize
                      for k in _WEIGHT_KEYS)
        act_in = bb * (Din + 4 * Dh) * 4 * 2      # 5 row inputs, double-buffered
        act_out = bb * packed_w * 4 * 2           # packed output, double-buffered
        return 2 * w_bytes + act_in + act_out     # 2x weights = conservative

    # shrink block_b if the estimate would blow a v7x-sized (64 MiB) budget
    while block_b > 8 and _vmem_estimate(block_b) > (56 << 20):
        block_b = max(8, ((block_b // 2) + 7) // 8 * 8)
    vmem_limit = int(min(max(2 * _vmem_estimate(block_b), 32 << 20), 64 << 20))

    grid = (pl.cdiv(B, block_b),)

    def row(d):
        return pl.BlockSpec((block_b, d), lambda i: (i, 0))

    def full(a):
        nd = a.ndim
        idx = lambda i: (0,) * nd                 # weights stay VMEM-resident
        try:
            return pl.BlockSpec(a.shape, idx, pipeline_mode=pl.Buffered(1))
        except TypeError:                          # older jax without pipeline_mode
            return pl.BlockSpec(a.shape, idx)

    smem = pl.BlockSpec(memory_space=pltpu.MemorySpace.SMEM)

    inputs = (
        x, h_prev, c_prev, n_prev, m_prev,
        params["conv_w"], params["conv_b"],
        params["ln_g"], params["ln_b"],
        params["R_all"], params["b_gate"], params["W_zo"], params["W_if"],
        params["gmat"], params["gn_scale"], params["gn_g"], params["gn_b"],
        params["W_up"], params["b_up"], params["W_down"], params["b_down"],
    )
    in_specs = [
        row(Din), row(Dh), row(Dh), row(Dh), row(Dh),
        smem, smem,
        full(params["ln_g"]), full(params["ln_b"]),
        full(params["R_all"]), full(params["b_gate"]),
        full(params["W_zo"]), full(params["W_if"]),
        full(params["gmat"]), smem, full(params["gn_g"]), full(params["gn_b"]),
        full(params["W_up"]), full(params["b_up"]),
        full(params["W_down"]), full(params["b_down"]),
    ]
    out_shape = jax.ShapeDtypeStruct((B, packed_w), f32)       # [out|h|c|n|m]
    out_specs = pl.BlockSpec((block_b, packed_w), lambda i: (i, 0))

    packed = pl.pallas_call(
        _slstm_kernel,
        grid=grid,
        in_specs=in_specs,
        out_specs=out_specs,
        out_shape=out_shape,
        compiler_params=pltpu.CompilerParams(
            dimension_semantics=("parallel",),
            vmem_limit_bytes=vmem_limit),
    )(*inputs)

    out = packed[:, :Din]
    h_t = packed[:, Din:Din + Dh]
    c_t = packed[:, Din + Dh:Din + 2 * Dh]
    n_t = packed[:, Din + 2 * Dh:Din + 3 * Dh]
    m_t = packed[:, Din + 3 * Dh:]
    return out, (h_t, c_t, n_t, m_t)


# --------------------- same-precision pure-JAX reference ---------------------

def slstm_block_reference(params, x, state):
    h_prev, c_prev, n_prev, m_prev = state
    f32 = jnp.float32
    Din = x.shape[-1]
    Dh = h_prev.shape[-1]
    Dh_p = params["R_all"].shape[1] // 4
    proj_p = params["W_up"].shape[1] // 2
    mm_dtype = params["W_zo"].dtype

    mu = jnp.mean(x, axis=-1, keepdims=True)
    xc = x - mu
    var = jnp.mean(xc * xc, axis=-1, keepdims=True)
    x_norm = xc * lax.rsqrt(var + 1e-5) * params["ln_g"] + params["ln_b"]

    w4, cb = params["conv_w"], params["conv_b"][0]
    conv = cb + w4[3] * x_norm
    for s, tap in ((1, 2), (2, 1), (3, 0)):
        shifted = jnp.pad(x_norm, ((0, 0), (s, 0)))[:, :Din]
        conv = conv + w4[tap] * shifted
    x_conv = conv * jax.nn.sigmoid(conv)

    def mm(a, w):
        return jnp.dot(a.astype(mm_dtype), w, preferred_element_type=f32)

    r = mm(h_prev, params["R_all"]) + params["b_gate"]
    zo = mm(x, params["W_zo"]) + r[:, :2 * Dh_p]
    if_ = mm(x_conv, params["W_if"]) + r[:, 2 * Dh_p:]
    z = jnp.tanh(zo[:, :Dh])
    o = jax.nn.sigmoid(zo[:, Dh_p:Dh_p + Dh])
    i_tilde = if_[:, :Dh]
    f_tilde = if_[:, Dh_p:Dh_p + Dh]

    m_t = jnp.maximum(f_tilde + m_prev, i_tilde)
    i_g = jnp.exp(i_tilde - m_t)
    f_g = jnp.exp(f_tilde + m_prev - m_t)
    c_t = f_g * c_prev + i_g * z
    n_t = f_g * n_prev + i_g
    h_t = o * c_t / (n_t + 1e-6)                       # exact divide in reference

    inv_head = params["gn_scale"][0]
    gmat = params["gmat"]
    g_mean = jnp.dot(h_t.astype(gmat.dtype), gmat,
                     preferred_element_type=f32) * inv_head
    diff = h_t - g_mean
    g_var = jnp.dot((diff * diff).astype(gmat.dtype), gmat,
                    preferred_element_type=f32) * inv_head
    h_norm = diff * lax.rsqrt(g_var + 1e-5) * params["gn_g"] + params["gn_b"]

    up = mm(h_norm, params["W_up"]) + params["b_up"]
    left, right = up[:, :proj_p], up[:, proj_p:]
    gelu_r = 0.5 * right * (1.0 + lax.erf(right / math.sqrt(2.0)))
    out = mm(left * gelu_r, params["W_down"]) + params["b_down"] + x
    return out, (h_t, c_t, n_t, m_t)


# ----------------------- deterministic parameter setup -----------------------

def _round_up(x, m):
    return ((x + m - 1) // m) * m


def _block_diag_dense(key, d_in, d_out, num_blocks, scale=0.1):
    bi, bo = d_in // num_blocks, d_out // num_blocks
    kw, kb = jax.random.split(key)
    blocks = scale * jax.random.normal(kw, (num_blocks, bi, bo), jnp.float32)
    W = jnp.zeros((d_in, d_out), jnp.float32)
    for b in range(num_blocks):
        W = W.at[b * bi:(b + 1) * bi, b * bo:(b + 1) * bo].set(blocks[b])
    bias = scale * jax.random.normal(kb, (1, d_out), jnp.float32)
    return W, bias


def make_params(key, input_size, hidden_size, num_heads, proj_factor=4 / 3,
                matmul_dtype=jnp.bfloat16):
    proj_size = int(hidden_size * proj_factor)
    head = hidden_size // num_heads
    Dh_p = _round_up(hidden_size, 128)      # 128-lane-aligned gate segments
    proj_p = _round_up(proj_size, 128)      # 128-lane-aligned up-proj segments
    f32 = jnp.float32
    keys = jax.random.split(key, 16)
    p = {}

    def padc(w, n):                          # zero-pad columns (last dim) to n
        return jnp.pad(w, ((0, 0), (0, n - w.shape[1])))

    # LayerNorm / GroupNorm affine (PyTorch defaults: ones / zeros)
    p["ln_g"] = jnp.ones((1, input_size), f32)
    p["ln_b"] = jnp.zeros((1, input_size), f32)
    p["gn_g"] = jnp.ones((1, hidden_size), f32)
    p["gn_b"] = jnp.zeros((1, hidden_size), f32)

    # Causal conv taps (1->1 channels, kernel 4) + bias, kept as SMEM scalars
    p["conv_w"] = 0.1 * jax.random.normal(keys[0], (4,), f32)
    p["conv_b"] = 0.1 * jax.random.normal(keys[1], (1,), f32)

    # Block-diagonal projections, stacked into fused, 128-aligned matmul weights
    Wz, bz = _block_diag_dense(keys[2], input_size, hidden_size, num_heads)
    Wi, bi = _block_diag_dense(keys[3], input_size, hidden_size, num_heads)
    Wf, bf = _block_diag_dense(keys[4], input_size, hidden_size, num_heads)
    Wo, bo = _block_diag_dense(keys[5], input_size, hidden_size, num_heads)
    Rz, rbz = _block_diag_dense(keys[6], hidden_size, hidden_size, num_heads)
    Ri, rbi = _block_diag_dense(keys[7], hidden_size, hidden_size, num_heads)
    Rf, rbf = _block_diag_dense(keys[8], hidden_size, hidden_size, num_heads)
    Ro, rbo = _block_diag_dense(keys[9], hidden_size, hidden_size, num_heads)

    p["W_zo"] = jnp.concatenate([padc(Wz, Dh_p), padc(Wo, Dh_p)],
                                axis=1).astype(matmul_dtype)
    p["W_if"] = jnp.concatenate([padc(Wi, Dh_p), padc(Wf, Dh_p)],
                                axis=1).astype(matmul_dtype)
    p["R_all"] = jnp.concatenate(
        [padc(Rz, Dh_p), padc(Ro, Dh_p), padc(Ri, Dh_p), padc(Rf, Dh_p)],
        axis=1).astype(matmul_dtype)
    p["b_gate"] = jnp.concatenate(
        [padc(bz + rbz, Dh_p), padc(bo + rbo, Dh_p),
         padc(bi + rbi, Dh_p), padc(bf + rbf, Dh_p)], axis=1)        # f32

    # Fused up-projection [left | right] and down projection (stored (in, out))
    upl_w = 0.1 * jax.random.normal(keys[10], (hidden_size, proj_size), f32)
    upl_b = 0.1 * jax.random.normal(keys[11], (1, proj_size), f32)
    upr_w = 0.1 * jax.random.normal(keys[12], (hidden_size, proj_size), f32)
    upr_b = 0.1 * jax.random.normal(keys[13], (1, proj_size), f32)
    p["W_up"] = jnp.concatenate([padc(upl_w, proj_p), padc(upr_w, proj_p)],
                                axis=1).astype(matmul_dtype)
    p["b_up"] = jnp.concatenate([padc(upl_b, proj_p), padc(upr_b, proj_p)], axis=1)
    w_down = 0.1 * jax.random.normal(keys[14], (proj_size, input_size), f32)
    p["W_down"] = jnp.pad(w_down, ((0, proj_p - proj_size), (0, 0))
                          ).astype(matmul_dtype)
    p["b_down"] = 0.1 * jax.random.normal(keys[15], (1, input_size), f32)

    # GroupNorm: exact 0/1 group indicator (matmul dtype) + 1/head scale (f32, SMEM)
    groups = jnp.arange(hidden_size) // head
    p["gmat"] = (groups[:, None] == groups[None, :]).astype(matmul_dtype)
    p["gn_scale"] = jnp.array([1.0 / head], f32)
    return p


# ----------------------------------- main ------------------------------------

if __name__ == "__main__":
    B = 2
    INPUT_SIZE = 32
    HIDDEN_SIZE = 48
    NUM_HEADS = 4

    key = jax.random.PRNGKey(0)
    kx, kh, kc, kn, km, kp = jax.random.split(key, 6)

    x = jax.random.normal(kx, (B, INPUT_SIZE), jnp.float32)
    h_prev = 0.1 * jax.random.normal(kh, (B, HIDDEN_SIZE), jnp.float32)
    c_prev = 0.1 * jax.random.normal(kc, (B, HIDDEN_SIZE), jnp.float32)
    n_prev = 1.0 + 0.1 * jax.random.normal(kn, (B, HIDDEN_SIZE), jnp.float32)
    m_prev = 0.1 * jax.random.normal(km, (B, HIDDEN_SIZE), jnp.float32)
    state = (h_prev, c_prev, n_prev, m_prev)

    params = make_params(kp, INPUT_SIZE, HIDDEN_SIZE, NUM_HEADS)

    fwd = jax.jit(slstm_block_forward)
    out, (h_t, c_t, n_t, m_t) = fwd(params, x, state)
    jax.block_until_ready((out, h_t, c_t, n_t, m_t))

    # same-precision structural check (bf16 weights in both, f32 accumulation)
    ref_out, (rh, rc, rn, rm) = jax.jit(slstm_block_reference)(params, x, state)
    jax.block_until_ready((ref_out, rh, rc, rn, rm))

    assert out.shape == (B, INPUT_SIZE)
    assert h_t.shape == c_t.shape == n_t.shape == m_t.shape == (B, HIDDEN_SIZE)
    for got, ref in ((out, ref_out), (h_t, rh), (c_t, rc), (n_t, rn), (m_t, rm)):
        assert bool(jnp.all(jnp.isfinite(got)))
        assert bool(jnp.allclose(got, ref, rtol=3e-2, atol=3e-2)), \
            float(jnp.max(jnp.abs(got - ref)))

    print("KERNEL_OK")
</pallas_src>

<mosaic_0001>
module attributes {stable_mosaic.version = 11 : i64} {
  func.func @_slstm_kernel(%arg0: i32, %arg1: memref<2x32xf32, #tpu.memory_space<vmem>>, %arg2: memref<2x48xf32, #tpu.memory_space<vmem>>, %arg3: memref<2x48xf32, #tpu.memory_space<vmem>>, %arg4: memref<2x48xf32, #tpu.memory_space<vmem>>, %arg5: memref<2x48xf32, #tpu.memory_space<vmem>>, %arg6: memref<4xf32, #tpu.memory_space<smem>>, %arg7: memref<1xf32, #tpu.memory_space<smem>>, %arg8: memref<1x32xf32, #tpu.memory_space<vmem>>, %arg9: memref<1x32xf32, #tpu.memory_space<vmem>>, %arg10: memref<48x512xbf16, #tpu.memory_space<vmem>>, %arg11: memref<1x512xf32, #tpu.memory_space<vmem>>, %arg12: memref<32x256xbf16, #tpu.memory_space<vmem>>, %arg13: memref<32x256xbf16, #tpu.memory_space<vmem>>, %arg14: memref<48x48xbf16, #tpu.memory_space<vmem>>, %arg15: memref<1xf32, #tpu.memory_space<smem>>, %arg16: memref<1x48xf32, #tpu.memory_space<vmem>>, %arg17: memref<1x48xf32, #tpu.memory_space<vmem>>, %arg18: memref<48x256xbf16, #tpu.memory_space<vmem>>, %arg19: memref<1x256xf32, #tpu.memory_space<vmem>>, %arg20: memref<128x32xbf16, #tpu.memory_space<vmem>>, %arg21: memref<1x32xf32, #tpu.memory_space<vmem>>, %arg22: memref<2x224xf32, #tpu.memory_space<vmem>>) attributes {dimension_semantics = [#tpu.dimension_semantics<parallel>], iteration_bounds = array<i64: 1>, scalar_prefetch = 0 : i64, scratch_operands = 0 : i64, tpu.core_type = #tpu.core_type<tc>, window_params = [{transform_indices = @transform_0, window_bounds = array<i64: 2, 32>}, {transform_indices = @transform_1, window_bounds = array<i64: 2, 48>}, {transform_indices = @transform_2, window_bounds = array<i64: 2, 48>}, {transform_indices = @transform_3, window_bounds = array<i64: 2, 48>}, {transform_indices = @transform_4, window_bounds = array<i64: 2, 48>}, {transform_indices = @transform_5, window_bounds = array<i64: 4>}, {transform_indices = @transform_6, window_bounds = array<i64: 1>}, {pipeline_mode = #tpu.pipeline_mode<synchronous>, transform_indices = @transform_7, window_bounds = array<i64: 1, 32>}, {pipeline_mode = #tpu.pipeline_mode<synchronous>, transform_indices = @transform_8, window_bounds = array<i64: 1, 32>}, {pipeline_mode = #tpu.pipeline_mode<synchronous>, transform_indices = @transform_9, window_bounds = array<i64: 48, 512>}, {pipeline_mode = #tpu.pipeline_mode<synchronous>, transform_indices = @transform_10, window_bounds = array<i64: 1, 512>}, {pipeline_mode = #tpu.pipeline_mode<synchronous>, transform_indices = @transform_11, window_bounds = array<i64: 32, 256>}, {pipeline_mode = #tpu.pipeline_mode<synchronous>, transform_indices = @transform_12, window_bounds = array<i64: 32, 256>}, {pipeline_mode = #tpu.pipeline_mode<synchronous>, transform_indices = @transform_13, window_bounds = array<i64: 48, 48>}, {transform_indices = @transform_14, window_bounds = array<i64: 1>}, {pipeline_mode = #tpu.pipeline_mode<synchronous>, transform_indices = @transform_15, window_bounds = array<i64: 1, 48>}, {pipeline_mode = #tpu.pipeline_mode<synchronous>, transform_indices = @transform_16, window_bounds = array<i64: 1, 48>}, {pipeline_mode = #tpu.pipeline_mode<synchronous>, transform_indices = @transform_17, window_bounds = array<i64: 48, 256>}, {pipeline_mode = #tpu.pipeline_mode<synchronous>, transform_indices = @transform_18, window_bounds = array<i64: 1, 256>}, {pipeline_mode = #tpu.pipeline_mode<synchronous>, transform_indices = @transform_19, window_bounds = array<i64: 128, 32>}, {pipeline_mode = #tpu.pipeline_mode<synchronous>, transform_indices = @transform_20, window_bounds = array<i64: 1, 32>}, {transform_indices = @transform_21, window_bounds = array<i64: 2, 224>}]} {
    %c0 = arith.constant 0 : index
    %c0_0 = arith.constant 0 : index
    %0 = vector.load %arg1[%c0, %c0_0] : memref<2x32xf32, #tpu.memory_space<vmem>>, vector<2x32xf32>
    %c0_1 = arith.constant 0 : index
    %c0_2 = arith.constant 0 : index
    %1 = vector.load %arg2[%c0_1, %c0_2] : memref<2x48xf32, #tpu.memory_space<vmem>>, vector<2x48xf32>
    %c0_3 = arith.constant 0 : index
    %c0_4 = arith.constant 0 : index
    %2 = vector.load %arg3[%c0_3, %c0_4] : memref<2x48xf32, #tpu.memory_space<vmem>>, vector<2x48xf32>
    %c0_5 = arith.constant 0 : index
    %c0_6 = arith.constant 0 : index
    %3 = vector.load %arg4[%c0_5, %c0_6] : memref<2x48xf32, #tpu.memory_space<vmem>>, vector<2x48xf32>
    %c0_7 = arith.constant 0 : index
    %c0_8 = arith.constant 0 : index
    %4 = vector.load %arg5[%c0_7, %c0_8] : memref<2x48xf32, #tpu.memory_space<vmem>>, vector<2x48xf32>
    %cst = arith.constant dense<0.000000e+00> : vector<2xf32>
    %5 = vector.multi_reduction <add>, %0, %cst [1] : vector<2x32xf32> to vector<2xf32>
    %6 = vector.shape_cast %5 : vector<2xf32> to vector<2x1xf32>
    %cst_9 = arith.constant 3.200000e+01 : f32
    %7 = vector.broadcast %cst_9 : f32 to vector<2x1xf32>
    %8 = arith.divf %6, %7 : vector<2x1xf32>
    %9 = vector.broadcast %8 : vector<2x1xf32> to vector<2x32xf32>
    %10 = arith.subf %0, %9 : vector<2x32xf32>
    %11 = arith.mulf %10, %10 : vector<2x32xf32>
    %cst_10 = arith.constant dense<0.000000e+00> : vector<2xf32>
    %12 = vector.multi_reduction <add>, %11, %cst_10 [1] : vector<2x32xf32> to vector<2xf32>
    %13 = vector.shape_cast %12 : vector<2xf32> to vector<2x1xf32>
    %cst_11 = arith.constant 3.200000e+01 : f32
    %14 = vector.broadcast %cst_11 : f32 to vector<2x1xf32>
    %15 = arith.divf %13, %14 : vector<2x1xf32>
    %cst_12 = arith.constant 9.99999974E-6 : f32
    %16 = vector.broadcast %cst_12 : f32 to vector<2x1xf32>
    %17 = arith.addf %15, %16 : vector<2x1xf32>
    %18 = math.rsqrt %17 : vector<2x1xf32>
    %19 = vector.broadcast %18 : vector<2x1xf32> to vector<2x32xf32>
    %20 = arith.mulf %10, %19 : vector<2x32xf32>
    %c0_13 = arith.constant 0 : index
    %c0_14 = arith.constant 0 : index
    %21 = vector.load %arg8[%c0_13, %c0_14] : memref<1x32xf32, #tpu.memory_space<vmem>>, vector<1x32xf32>
    %22 = vector.broadcast %21 : vector<1x32xf32> to vector<2x32xf32>
    %23 = arith.mulf %20, %22 : vector<2x32xf32>
    %c0_15 = arith.constant 0 : index
    %c0_16 = arith.constant 0 : index
    %24 = vector.load %arg9[%c0_15, %c0_16] : memref<1x32xf32, #tpu.memory_space<vmem>>, vector<1x32xf32>
    %25 = vector.broadcast %24 : vector<1x32xf32> to vector<2x32xf32>
    %26 = arith.addf %23, %25 : vector<2x32xf32>
    %c0_17 = arith.constant 0 : index
    %27 = memref.load %arg7[%c0_17] : memref<1xf32, #tpu.memory_space<smem>>
    %c3 = arith.constant 3 : index
    %28 = memref.load %arg6[%c3] : memref<4xf32, #tpu.memory_space<smem>>
    %29 = vector.broadcast %28 : f32 to vector<2x32xf32>
    %30 = arith.mulf %29, %26 : vector<2x32xf32>
    %31 = vector.broadcast %27 : f32 to vector<2x32xf32>
    %32 = arith.addf %31, %30 : vector<2x32xf32>
    %cst_18 = arith.constant 0.000000e+00 : f32
    %33 = vector.broadcast %cst_18 : f32 to vector<2x1xf32>
    %34 = vector.extract_strided_slice %26 {offsets = [0, 0], sizes = [2, 31], strides = [1, 1]} : vector<2x32xf32> to vector<2x31xf32>
    %35 = tpu.concatenate %33, %34 in 1 : vector<2x1xf32>, vector<2x31xf32> -> vector<2x32xf32>
    %c2 = arith.constant 2 : index
    %36 = memref.load %arg6[%c2] : memref<4xf32, #tpu.memory_space<smem>>
    %37 = vector.broadcast %36 : f32 to vector<2x32xf32>
    %38 = arith.mulf %37, %35 : vector<2x32xf32>
    %39 = arith.addf %32, %38 : vector<2x32xf32>
    %cst_19 = arith.constant 0.000000e+00 : f32
    %40 = vector.broadcast %cst_19 : f32 to vector<2x2xf32>
    %41 = vector.extract_strided_slice %26 {offsets = [0, 0], sizes = [2, 30], strides = [1, 1]} : vector<2x32xf32> to vector<2x30xf32>
    %42 = tpu.concatenate %40, %41 in 1 : vector<2x2xf32>, vector<2x30xf32> -> vector<2x32xf32>
    %c1 = arith.constant 1 : index
    %43 = memref.load %arg6[%c1] : memref<4xf32, #tpu.memory_space<smem>>
    %44 = vector.broadcast %43 : f32 to vector<2x32xf32>
    %45 = arith.mulf %44, %42 : vector<2x32xf32>
    %46 = arith.addf %39, %45 : vector<2x32xf32>
    %cst_20 = arith.constant 0.000000e+00 : f32
    %47 = vector.broadcast %cst_20 : f32 to vector<2x3xf32>
    %48 = vector.extract_strided_slice %26 {offsets = [0, 0], sizes = [2, 29], strides = [1, 1]} : vector<2x32xf32> to vector<2x29xf32>
    %49 = tpu.concatenate %47, %48 in 1 : vector<2x3xf32>, vector<2x29xf32> -> vector<2x32xf32>
    %c0_21 = arith.constant 0 : index
    %50 = memref.load %arg6[%c0_21] : memref<4xf32, #tpu.memory_space<smem>>
    %51 = vector.broadcast %50 : f32 to vector<2x32xf32>
    %52 = arith.mulf %51, %49 : vector<2x32xf32>
    %53 = arith.addf %46, %52 : vector<2x32xf32>
    %54 = arith.negf %53 : vector<2x32xf32>
    %55 = math.exp %54 : vector<2x32xf32>
    %cst_22 = arith.constant 1.000000e+00 : f32
    %56 = vector.broadcast %cst_22 : f32 to vector<2x32xf32>
    %57 = arith.addf %56, %55 : vector<2x32xf32>
    %58 = arith.divf %56, %57 : vector<2x32xf32>
    %59 = arith.mulf %53, %58 : vector<2x32xf32>
    %60 = arith.truncf %1 : vector<2x48xf32> to vector<2x48xbf16>
    %c0_23 = arith.constant 0 : index
    %c0_24 = arith.constant 0 : index
    %61 = vector.load %arg10[%c0_23, %c0_24] : memref<48x512xbf16, #tpu.memory_space<vmem>>, vector<48x512xbf16>
    %cst_25 = arith.constant dense<0.000000e+00> : vector<2x512xf32>
    %62 = tpu.matmul %60, %61, %cst_25 {dimension_numbers = #tpu.dot_dimension_numbers<[1], [0], [0], [1], [0, 0, 1, 1], [], []>} : vector<2x48xbf16>, vector<48x512xbf16>, vector<2x512xf32> -> vector<2x512xf32>
    %c0_26 = arith.constant 0 : index
    %c0_27 = arith.constant 0 : index
    %63 = vector.load %arg11[%c0_26, %c0_27] : memref<1x512xf32, #tpu.memory_space<vmem>>, vector<1x512xf32>
    %64 = vector.broadcast %63 : vector<1x512xf32> to vector<2x512xf32>
    %65 = arith.addf %62, %64 : vector<2x512xf32>
    %66 = arith.truncf %0 : vector<2x32xf32> to vector<2x32xbf16>
    %c0_28 = arith.constant 0 : index
    %c0_29 = arith.constant 0 : index
    %67 = vector.load %arg12[%c0_28, %c0_29] : memref<32x256xbf16, #tpu.memory_space<vmem>>, vector<32x256xbf16>
    %cst_30 = arith.constant dense<0.000000e+00> : vector<2x256xf32>
    %68 = tpu.matmul %66, %67, %cst_30 {dimension_numbers = #tpu.dot_dimension_numbers<[1], [0], [0], [1], [0, 0, 1, 1], [], []>} : vector<2x32xbf16>, vector<32x256xbf16>, vector<2x256xf32> -> vector<2x256xf32>
    %69 = vector.extract_strided_slice %65 {offsets = [0, 0], sizes = [2, 256], strides = [1, 1]} : vector<2x512xf32> to vector<2x256xf32>
    %70 = arith.addf %68, %69 : vector<2x256xf32>
    %71 = arith.truncf %59 : vector<2x32xf32> to vector<2x32xbf16>
    %c0_31 = arith.constant 0 : index
    %c0_32 = arith.constant 0 : index
    %72 = vector.load %arg13[%c0_31, %c0_32] : memref<32x256xbf16, #tpu.memory_space<vmem>>, vector<32x256xbf16>
    %cst_33 = arith.constant dense<0.000000e+00> : vector<2x256xf32>
    %73 = tpu.matmul %71, %72, %cst_33 {dimension_numbers = #tpu.dot_dimension_numbers<[1], [0], [0], [1], [0, 0, 1, 1], [], []>} : vector<2x32xbf16>, vector<32x256xbf16>, vector<2x256xf32> -> vector<2x256xf32>
    %74 = vector.extract_strided_slice %65 {offsets = [0, 256], sizes = [2, 256], strides = [1, 1]} : vector<2x512xf32> to vector<2x256xf32>
    %75 = arith.addf %73, %74 : vector<2x256xf32>
    %76 = vector.extract_strided_slice %70 {offsets = [0, 0], sizes = [2, 48], strides = [1, 1]} : vector<2x256xf32> to vector<2x48xf32>
    %77 = math.tanh %76 : vector<2x48xf32>
    %78 = vector.extract_strided_slice %70 {offsets = [0, 128], sizes = [2, 48], strides = [1, 1]} : vector<2x256xf32> to vector<2x48xf32>
    %79 = arith.negf %78 : vector<2x48xf32>
    %80 = math.exp %79 : vector<2x48xf32>
    %cst_34 = arith.constant 1.000000e+00 : f32
    %81 = vector.broadcast %cst_34 : f32 to vector<2x48xf32>
    %82 = arith.addf %81, %80 : vector<2x48xf32>
    %83 = arith.divf %81, %82 : vector<2x48xf32>
    %84 = vector.extract_strided_slice %75 {offsets = [0, 0], sizes = [2, 48], strides = [1, 1]} : vector<2x256xf32> to vector<2x48xf32>
    %85 = vector.extract_strided_slice %75 {offsets = [0, 128], sizes = [2, 48], strides = [1, 1]} : vector<2x256xf32> to vector<2x48xf32>
    %86 = arith.addf %85, %4 : vector<2x48xf32>
    %87 = arith.maximumf %86, %84 : vector<2x48xf32>
    %88 = arith.subf %84, %87 : vector<2x48xf32>
    %89 = math.exp %88 : vector<2x48xf32>
    %90 = arith.addf %85, %4 : vector<2x48xf32>
    %91 = arith.subf %90, %87 : vector<2x48xf32>
    %92 = math.exp %91 : vector<2x48xf32>
    %93 = arith.mulf %92, %2 : vector<2x48xf32>
    %94 = arith.mulf %89, %77 : vector<2x48xf32>
    %95 = arith.addf %93, %94 : vector<2x48xf32>
    %96 = arith.mulf %92, %3 : vector<2x48xf32>
    %97 = arith.addf %96, %89 : vector<2x48xf32>
    %98 = arith.mulf %83, %95 : vector<2x48xf32>
    %cst_35 = arith.constant 9.99999997E-7 : f32
    %99 = vector.broadcast %cst_35 : f32 to vector<2x48xf32>
    %100 = arith.addf %97, %99 : vector<2x48xf32>
    %101 = tpu.reciprocal %100 {approx = true} : vector<2x48xf32> -> vector<2x48xf32>
    %102 = arith.mulf %98, %101 : vector<2x48xf32>
    %c0_36 = arith.constant 0 : index
    %103 = memref.load %arg15[%c0_36] : memref<1xf32, #tpu.memory_space<smem>>
    %c0_37 = arith.constant 0 : index
    %c0_38 = arith.constant 0 : index
    %104 = vector.load %arg14[%c0_37, %c0_38] : memref<48x48xbf16, #tpu.memory_space<vmem>>, vector<48x48xbf16>
    %105 = arith.truncf %102 : vector<2x48xf32> to vector<2x48xbf16>
    %cst_39 = arith.constant dense<0.000000e+00> : vector<2x48xf32>
    %106 = tpu.matmul %105, %104, %cst_39 {dimension_numbers = #tpu.dot_dimension_numbers<[1], [0], [0], [1], [0, 0, 1, 1], [], []>} : vector<2x48xbf16>, vector<48x48xbf16>, vector<2x48xf32> -> vector<2x48xf32>
    %107 = vector.broadcast %103 : f32 to vector<2x48xf32>
    %108 = arith.mulf %106, %107 : vector<2x48xf32>
    %109 = arith.subf %102, %108 : vector<2x48xf32>
    %110 = arith.mulf %109, %109 : vector<2x48xf32>
    %111 = arith.truncf %110 : vector<2x48xf32> to vector<2x48xbf16>
    %cst_40 = arith.constant dense<0.000000e+00> : vector<2x48xf32>
    %112 = tpu.matmul %111, %104, %cst_40 {dimension_numbers = #tpu.dot_dimension_numbers<[1], [0], [0], [1], [0, 0, 1, 1], [], []>} : vector<2x48xbf16>, vector<48x48xbf16>, vector<2x48xf32> -> vector<2x48xf32>
    %113 = vector.broadcast %103 : f32 to vector<2x48xf32>
    %114 = arith.mulf %112, %113 : vector<2x48xf32>
    %cst_41 = arith.constant 9.99999974E-6 : f32
    %115 = vector.broadcast %cst_41 : f32 to vector<2x48xf32>
    %116 = arith.addf %114, %115 : vector<2x48xf32>
    %117 = math.rsqrt %116 : vector<2x48xf32>
    %118 = arith.mulf %109, %117 : vector<2x48xf32>
    %c0_42 = arith.constant 0 : index
    %c0_43 = arith.constant 0 : index
    %119 = vector.load %arg16[%c0_42, %c0_43] : memref<1x48xf32, #tpu.memory_space<vmem>>, vector<1x48xf32>
    %120 = vector.broadcast %119 : vector<1x48xf32> to vector<2x48xf32>
    %121 = arith.mulf %118, %120 : vector<2x48xf32>
    %c0_44 = arith.constant 0 : index
    %c0_45 = arith.constant 0 : index
    %122 = vector.load %arg17[%c0_44, %c0_45] : memref<1x48xf32, #tpu.memory_space<vmem>>, vector<1x48xf32>
    %123 = vector.broadcast %122 : vector<1x48xf32> to vector<2x48xf32>
    %124 = arith.addf %121, %123 : vector<2x48xf32>
    %125 = arith.truncf %124 : vector<2x48xf32> to vector<2x48xbf16>
    %c0_46 = arith.constant 0 : index
    %c0_47 = arith.constant 0 : index
    %126 = vector.load %arg18[%c0_46, %c0_47] : memref<48x256xbf16, #tpu.memory_space<vmem>>, vector<48x256xbf16>
    %cst_48 = arith.constant dense<0.000000e+00> : vector<2x256xf32>
    %127 = tpu.matmul %125, %126, %cst_48 {dimension_numbers = #tpu.dot_dimension_numbers<[1], [0], [0], [1], [0, 0, 1, 1], [], []>} : vector<2x48xbf16>, vector<48x256xbf16>, vector<2x256xf32> -> vector<2x256xf32>
    %c0_49 = arith.constant 0 : index
    %c0_50 = arith.constant 0 : index
    %128 = vector.load %arg19[%c0_49, %c0_50] : memref<1x256xf32, #tpu.memory_space<vmem>>, vector<1x256xf32>
    %129 = vector.broadcast %128 : vector<1x256xf32> to vector<2x256xf32>
    %130 = arith.addf %127, %129 : vector<2x256xf32>
    %131 = vector.extract_strided_slice %130 {offsets = [0, 0], sizes = [2, 128], strides = [1, 1]} : vector<2x256xf32> to vector<2x128xf32>
    %132 = vector.extract_strided_slice %130 {offsets = [0, 128], sizes = [2, 128], strides = [1, 1]} : vector<2x256xf32> to vector<2x128xf32>
    %cst_51 = arith.constant 5.000000e-01 : f32
    %133 = vector.broadcast %cst_51 : f32 to vector<2x128xf32>
    %134 = arith.mulf %133, %132 : vector<2x128xf32>
    %cst_52 = arith.constant 0.707106769 : f32
    %135 = vector.broadcast %cst_52 : f32 to vector<2x128xf32>
    %136 = arith.mulf %132, %135 : vector<2x128xf32>
    %137 = math.erf %136 : vector<2x128xf32>
    %cst_53 = arith.constant 1.000000e+00 : f32
    %138 = vector.broadcast %cst_53 : f32 to vector<2x128xf32>
    %139 = arith.addf %138, %137 : vector<2x128xf32>
    %140 = arith.mulf %134, %139 : vector<2x128xf32>
    %141 = arith.mulf %131, %140 : vector<2x128xf32>
    %142 = arith.truncf %141 : vector<2x128xf32> to vector<2x128xbf16>
    %c0_54 = arith.constant 0 : index
    %c0_55 = arith.constant 0 : index
    %143 = vector.load %arg20[%c0_54, %c0_55] : memref<128x32xbf16, #tpu.memory_space<vmem>>, vector<128x32xbf16>
    %cst_56 = arith.constant dense<0.000000e+00> : vector<2x32xf32>
    %144 = tpu.matmul %142, %143, %cst_56 {dimension_numbers = #tpu.dot_dimension_numbers<[1], [0], [0], [1], [0, 0, 1, 1], [], []>} : vector<2x128xbf16>, vector<128x32xbf16>, vector<2x32xf32> -> vector<2x32xf32>
    %c0_57 = arith.constant 0 : index
    %c0_58 = arith.constant 0 : index
    %145 = vector.load %arg21[%c0_57, %c0_58] : memref<1x32xf32, #tpu.memory_space<vmem>>, vector<1x32xf32>
    %146 = vector.broadcast %145 : vector<1x32xf32> to vector<2x32xf32>
    %147 = arith.addf %144, %146 : vector<2x32xf32>
    %148 = arith.addf %147, %0 : vector<2x32xf32>
    %149 = tpu.concatenate %148, %102, %95, %97, %87 in 1 : vector<2x32xf32>, vector<2x48xf32>, vector<2x48xf32>, vector<2x48xf32>, vector<2x48xf32> -> vector<2x224xf32>
    %c0_59 = arith.constant 0 : index
    %c0_60 = arith.constant 0 : index
    %150 = vector.load %arg22[%c0_59, %c0_60] : memref<2x224xf32, #tpu.memory_space<vmem>>, vector<2x224xf32>
    tpu.vector_store %arg22[%c0_59, %c0_60], %149 {strides = array<i32>} : memref<2x224xf32, #tpu.memory_space<vmem>>, vector<2x224xf32>,
    return
  }
  func.func @transform_0(%arg0: i32) -> (i32, i32) {
    %c0_i32 = arith.constant 0 : i32
    %c0_i32_0 = arith.constant 0 : i32
    return %arg0, %c0_i32 : i32, i32
  }
  func.func @transform_1(%arg0: i32) -> (i32, i32) {
    %c0_i32 = arith.constant 0 : i32
    %c0_i32_0 = arith.constant 0 : i32
    return %arg0, %c0_i32 : i32, i32
  }
  func.func @transform_2(%arg0: i32) -> (i32, i32) {
    %c0_i32 = arith.constant 0 : i32
    %c0_i32_0 = arith.constant 0 : i32
    return %arg0, %c0_i32 : i32, i32
  }
  func.func @transform_3(%arg0: i32) -> (i32, i32) {
    %c0_i32 = arith.constant 0 : i32
    %c0_i32_0 = arith.constant 0 : i32
    return %arg0, %c0_i32 : i32, i32
  }
  func.func @transform_4(%arg0: i32) -> (i32, i32) {
    %c0_i32 = arith.constant 0 : i32
    %c0_i32_0 = arith.constant 0 : i32
    return %arg0, %c0_i32 : i32, i32
  }
  func.func @transform_5(%arg0: i32) -> i32 {
    %c0_i32 = arith.constant 0 : i32
    %c0_i32_0 = arith.constant 0 : i32
    return %c0_i32 : i32
  }
  func.func @transform_6(%arg0: i32) -> i32 {
    %c0_i32 = arith.constant 0 : i32
    %c0_i32_0 = arith.constant 0 : i32
    return %c0_i32 : i32
  }
  func.func @transform_7(%arg0: i32) -> (i32, i32) {
    %c0_i32 = arith.constant 0 : i32
    %c0_i32_0 = arith.constant 0 : i32
    %c0_i32_1 = arith.constant 0 : i32
    return %c0_i32, %c0_i32_0 : i32, i32
  }
  func.func @transform_8(%arg0: i32) -> (i32, i32) {
    %c0_i32 = arith.constant 0 : i32
    %c0_i32_0 = arith.constant 0 : i32
    %c0_i32_1 = arith.constant 0 : i32
    return %c0_i32, %c0_i32_0 : i32, i32
  }
  func.func @transform_9(%arg0: i32) -> (i32, i32) {
    %c0_i32 = arith.constant 0 : i32
    %c0_i32_0 = arith.constant 0 : i32
    %c0_i32_1 = arith.constant 0 : i32
    return %c0_i32, %c0_i32_0 : i32, i32
  }
  func.func @transform_10(%arg0: i32) -> (i32, i32) {
    %c0_i32 = arith.constant 0 : i32
    %c0_i32_0 = arith.constant 0 : i32
    %c0_i32_1 = arith.constant 0 : i32
    return %c0_i32, %c0_i32_0 : i32, i32
  }
  func.func @transform_11(%arg0: i32) -> (i32, i32) {
    %c0_i32 = arith.constant 0 : i32
    %c0_i32_0 = arith.constant 0 : i32
    %c0_i32_1 = arith.constant 0 : i32
    return %c0_i32, %c0_i32_0 : i32, i32
  }
  func.func @transform_12(%arg0: i32) -> (i32, i32) {
    %c0_i32 = arith.constant 0 : i32
    %c0_i32_0 = arith.constant 0 : i32
    %c0_i32_1 = arith.constant 0 : i32
    return %c0_i32, %c0_i32_0 : i32, i32
  }
  func.func @transform_13(%arg0: i32) -> (i32, i32) {
    %c0_i32 = arith.constant 0 : i32
    %c0_i32_0 = arith.constant 0 : i32
    %c0_i32_1 = arith.constant 0 : i32
    return %c0_i32, %c0_i32_0 : i32, i32
  }
  func.func @transform_14(%arg0: i32) -> i32 {
    %c0_i32 = arith.constant 0 : i32
    %c0_i32_0 = arith.constant 0 : i32
    return %c0_i32 : i32
  }
  func.func @transform_15(%arg0: i32) -> (i32, i32) {
    %c0_i32 = arith.constant 0 : i32
    %c0_i32_0 = arith.constant 0 : i32
    %c0_i32_1 = arith.constant 0 : i32
    return %c0_i32, %c0_i32_0 : i32, i32
  }
  func.func @transform_16(%arg0: i32) -> (i32, i32) {
    %c0_i32 = arith.constant 0 : i32
    %c0_i32_0 = arith.constant 0 : i32
    %c0_i32_1 = arith.constant 0 : i32
    return %c0_i32, %c0_i32_0 : i32, i32
  }
  func.func @transform_17(%arg0: i32) -> (i32, i32) {
    %c0_i32 = arith.constant 0 : i32
    %c0_i32_0 = arith.constant 0 : i32
    %c0_i32_1 = arith.constant 0 : i32
    return %c0_i32, %c0_i32_0 : i32, i32
  }
  func.func @transform_18(%arg0: i32) -> (i32, i32) {
    %c0_i32 = arith.constant 0 : i32
    %c0_i32_0 = arith.constant 0 : i32
    %c0_i32_1 = arith.constant 0 : i32
    return %c0_i32, %c0_i32_0 : i32, i32
  }
  func.func @transform_19(%arg0: i32) -> (i32, i32) {
    %c0_i32 = arith.constant 0 : i32
    %c0_i32_0 = arith.constant 0 : i32
    %c0_i32_1 = arith.constant 0 : i32
    return %c0_i32, %c0_i32_0 : i32, i32
  }
  func.func @transform_20(%arg0: i32) -> (i32, i32) {
    %c0_i32 = arith.constant 0 : i32
    %c0_i32_0 = arith.constant 0 : i32
    %c0_i32_1 = arith.constant 0 : i32
    return %c0_i32, %c0_i32_0 : i32, i32
  }
  func.func @transform_21(%arg0: i32) -> (i32, i32) {
    %c0_i32 = arith.constant 0 : i32
    %c0_i32_0 = arith.constant 0 : i32
    return %arg0, %c0_i32 : i32, i32
  }
}

</mosaic_0001>

<bundles_post_ra>
// kernel: slstm_block_forward.1
= control target key start
LH: loop header
LB: loop body
LE: loop exit
PB: predicated region body
PF: predicated region fallthrough
CT: control target
= control target key end

     0   :  { %s1602_s0 = inlined_call_operand.vmem [shape: f32[2,32], index: 0, kind: input, shape index: {}]   ;;  %s1603_s1 = inlined_call_operand.vmem [shape: f32[2,48], index: 1, kind: input, shape index: {}]   ;;  %s1604_s2 = inlined_call_operand.vmem [shape: f32[2,48], index: 2, kind: input, shape index: {}]   ;;  %s1605_s3 = inlined_call_operand.vmem [shape: f32[2,48], index: 3, kind: input, shape index: {}]   ;;  %s1606_s4 = inlined_call_operand.vmem [shape: f32[2,48], index: 4, kind: input, shape index: {}]   ;;  %s1607_s5 = inlined_call_operand.vmem [shape: f32[4], index: 5, kind: input, shape index: {}]   ;;  %s1608_s6 = inlined_call_operand.<no memory space> [shape: f32[1], index: 6, kind: input, shape index: {}]   ;;  %s1609_s7 = inlined_call_operand.vmem [shape: f32[1,32], index: 7, kind: input, shape index: {}]   ;;  %s1610_s8 = inlined_call_operand.vmem [shape: f32[1,32], index: 8, kind: input, shape index: {}]   ;;  %s1611_s9 = inlined_call_operand.hbm [shape: bf16[48,512], index: 9, kind: input, shape index: {}]   ;;  %s1612_s10 = inlined_call_operand.vmem [shape: f32[1,512], index: 10, kind: input, shape index: {}]   ;;  %s1613_s11 = inlined_call_operand.vmem [shape: bf16[32,256], index: 11, kind: input, shape index: {}]   ;;  %s1614_s12 = inlined_call_operand.hbm [shape: bf16[32,256], index: 12, kind: input, shape index: {}]   ;;  %s1615_s13 = inlined_call_operand.vmem [shape: bf16[48,48], index: 13, kind: input, shape index: {}]   ;;  %s1616_s14 = inlined_call_operand.<no memory space> [shape: f32[1], index: 14, kind: input, shape index: {}]   ;;  %s1617_s15 = inlined_call_operand.vmem [shape: f32[1,48], index: 15, kind: input, shape index: {}]   ;;  %s1618_s16 = inlined_call_operand.vmem [shape: f32[1,48], index: 16, kind: input, shape index: {}]   ;;  %s1619_s17 = inlined_call_operand.vmem [shape: bf16[48,256], index: 17, kind: input, shape index: {}]   ;;  %s1620_s18 = inlined_call_operand.hbm [shape: f32[1,256], index: 18, kind: input, shape index: {}]   ;;  %s1621_s19 = inlined_call_operand.vmem [shape: bf16[128,32], index: 19, kind: input, shape index: {}]   ;;  %s1622_s20 = inlined_call_operand.hbm [shape: f32[1,32], index: 20, kind: input, shape index: {}]   ;;  %s1623_s21 = inlined_call_operand.vmem [shape: f32[2,224], index: 21, kind: output, shape index: {}]  }
   0x1   :  { %1624 = sst [smem:[#allocation17_spill]] %s1602_s0 }
   0x2   :  { %1625 = sst [smem:[#allocation18_spill]] %s1603_s1 }
   0x3   :  { %1626 = sst [smem:[#allocation19_spill]] %s1604_s2 }
   0x4   :  { %1627 = sst [smem:[#allocation20_spill]] %s1605_s3 }
   0x5   :  { %1628 = sst [smem:[#allocation21_spill]] %s1606_s4 }
   0x6   :  { %1629 = sst [smem:[#allocation22_spill]] %s1607_s5 }
   0x7   :  { %28 = vsyncpa [#allocation6], 0 }
   0x8   :  { %29 = vsyncpa [#allocation5], 0 }
   0x9   :  { %30 = vsyncpa [#allocation9], 0 }
   0xa   :  { %31 = vsyncpa [#allocation12], 0  ;;  %s1260_s2 = smov [#allocation8]   ;;  %s1630_s3 = sld [smem:[#allocation22_spill]] }
   0xb   :  { %s79_s25 = sshll.u32 %s1260_s2, 4  ;;  %s1152_s4 = scalar_lea.hbm %s1614_s12, 512  ;;  %s80_s25 = int_to_ptr.vmem [resolvable:$true] %s79_s25 }
   0xc   :  { %p1153_p0 = scmp.ne.s32.totalorder %s1614_s12, %s1152_s4  ;;  %p1156_p1 = scmp.lt.u32.totalorder %s1152_s4, %s1614_s12 }
   0xe   :  { %p1158_p2 = pnand %p1156_p1, %p1153_p0 }
  0x10   :  { %s48_s28 = sshll.u32 %s1630_s3, 4  ;;  %s49_s28 = int_to_ptr.vmem [resolvable:$true] %s48_s28 }
  0x11   :  { %1161 = shalt.err (!%p1158_p2)
}
  0x12   :  { %s1162_s1 = scalar_lea.vmem %s80_s25, 512  ;;  %p1167_p4 = scmp.lt.s32.totalorder %s80_s25, %s80_s25 }
  0x13   :  { %p1163_p3 = scmp.ne.s32.totalorder %s80_s25, %s1162_s1  ;;  %p1168_p5 = scmp.lt.s32.totalorder %s1162_s1, %s1162_s1 }
  0x15   :  { %p1169_p6 = por %p1168_p5, %p1167_p4 }
  0x17   :  { %p1170_p7 = pnand %p1169_p6, %p1163_p3 }
  0x19   :  { %1173 = shalt.err (!%p1170_p7)
}
  0x1a   :  { %s1261_s24 = smov 128   ;;  %s1262_s2 = smov 8  }
  0x1b   :  { %85 = dma.hbm_to_vmem [thread:$0]  %s1614_s12, 512, %s80_s25, [#allocation9], %s1261_s24, %s1261_s24, %s1262_s2  }
  0x1c   :  { %s1174_s3 = scalar_lea.vmem %s49_s28, 16  ;;  %p1179_p9 = scmp.lt.s32.totalorder %s49_s28, %s49_s28 }
  0x1d   :  { %p1175_p8 = scmp.ne.s32.totalorder %s49_s28, %s1174_s3  ;;  %p1180_p10 = scmp.lt.s32.totalorder %s1174_s3, %s1174_s3 }
  0x1f   :  { %p1181_p11 = por %p1180_p10, %p1179_p9 }
  0x21   :  { %p1182_p12 = pnand %p1181_p11, %p1175_p8 }
  0x23   :  { %1185 = shalt.err (!%p1182_p12)
}
  0x24   :  { %s1263_s29 = smov [#allocation4]   ;;  %s1264_s0 = smov [#allocation7]  }
  0x25   :  { %51 = dma.vmem_to_smem %s49_s28, 16, %s1263_s29, [#allocation6]  }
  0x26   :  { %s63_s4 = sshll.u32 %s1264_s0, 4  ;;  %s1186_s22 = scalar_lea.hbm %s1611_s9, 1536  ;;  %s64_s4 = int_to_ptr.vmem [resolvable:$true] %s63_s4 }
  0x27   :  { %p1187_p13 = scmp.ne.s32.totalorder %s1611_s9, %s1186_s22  ;;  %p1190_p0 = scmp.lt.u32.totalorder %s1186_s22, %s1611_s9 }
  0x29   :  { %p1192_p1 = pnand %p1190_p0, %p1187_p13 }
  0x2b   :  { %1195 = shalt.err (!%p1192_p1)
}
  0x2c   :  { %s1196_s24 = scalar_lea.vmem %s64_s4, 1536  ;;  %p1201_p3 = scmp.lt.s32.totalorder %s64_s4, %s64_s4 }
  0x2d   :  { %p1197_p2 = scmp.ne.s32.totalorder %s64_s4, %s1196_s24  ;;  %p1202_p4 = scmp.lt.s32.totalorder %s1196_s24, %s1196_s24 }
  0x2f   :  { %p1203_p5 = por %p1202_p4, %p1201_p3 }
  0x31   :  { %p1204_p6 = pnand %p1203_p5, %p1197_p2 }
  0x33   :  { %1207 = shalt.err (!%p1204_p6)
}
  0x34   :  { %s1265_s28 = smov 256   ;;  %s1266_s2 = smov 16  }
  0x35   :  { %69 = dma.hbm_to_vmem [thread:$0]  %s1611_s9, 1536, %s64_s4, [#allocation5], %s1265_s28, %s1265_s28, %s1266_s2  }
  0x36   :  { %s1267_s3 = smov [#allocation10]   ;;  %s1268_s0 = smov [#allocation11]  }
  0x37   :  { %s102_s29 = sshll.u32 %s1267_s3, 4  ;;  %s114_s30 = sshll.u32 %s1268_s0, 4  ;;  %s103_s29 = int_to_ptr.vmem [resolvable:$true] %s102_s29  ;;  %s115_s30 = int_to_ptr.vmem [resolvable:$true] %s114_s30 }
  0x38   :  { %s1208_s23 = scalar_lea.hbm %s1620_s18, 32 }
  0x39   :  { %p1209_p7 = scmp.ne.s32.totalorder %s1620_s18, %s1208_s23  ;;  %p1212_p8 = scmp.lt.u32.totalorder %s1208_s23, %s1620_s18 }
  0x3b   :  { %p1214_p9 = pnand %p1212_p8, %p1209_p7 }
  0x3d   :  { %1217 = shalt.err (!%p1214_p9)
}
  0x3e   :  { %s1218_s9 = scalar_lea.vmem %s103_s29, 32  ;;  %p1223_p11 = scmp.lt.s32.totalorder %s103_s29, %s103_s29 }
  0x3f   :  { %p1219_p10 = scmp.ne.s32.totalorder %s103_s29, %s1218_s9  ;;  %p1224_p12 = scmp.lt.s32.totalorder %s1218_s9, %s1218_s9 }
  0x41   :  { %p1225_p13 = por %p1224_p12, %p1223_p11 }
  0x43   :  { %p1226_p0 = pnand %p1225_p13, %p1219_p10 }
  0x45   :  { %1229 = shalt.err (!%p1226_p0)
}
  0x46   :  { %105 = dma.hbm_to_vmem [thread:$0]  %s1620_s18, 32, %s103_s29, [#allocation9]  }
  0x47   :  { %s1230_s27 = scalar_lea.hbm %s1622_s20, 16 }
  0x48   :  { %p1231_p1 = scmp.ne.s32.totalorder %s1622_s20, %s1230_s27  ;;  %p1234_p2 = scmp.lt.u32.totalorder %s1230_s27, %s1622_s20 }
  0x4a   :  { %p1236_p3 = pnand %p1234_p2, %p1231_p1 }
  0x4c   :  { %1239 = shalt.err (!%p1236_p3)
}
  0x4d   :  { %s1240_s23 = scalar_lea.vmem %s115_s30, 16  ;;  %s1244_s1 = scalar_lea.vmem %s115_s30, 32 }
  0x4e   :  { %p1241_p4 = scmp.ne.s32.totalorder %s115_s30, %s1240_s23  ;;  %p1245_p5 = scmp.lt.s32.totalorder %s115_s30, %s115_s30 }
  0x4f   :  { %p1246_p6 = scmp.lt.s32.totalorder %s1244_s1, %s1240_s23 }
  0x51   :  { %p1247_p7 = por %p1246_p6, %p1245_p5 }
  0x53   :  { %p1248_p8 = pnand %p1247_p7, %p1241_p4 }
  0x55   :  { %1251 = shalt.err (!%p1248_p8)
}
  0x56   :  { %117 = dma.hbm_to_vmem [thread:$0]  %s1622_s20, 16, %s115_s30, [#allocation12]  }
  0x57   :  { %1252 = dma.done.wait [#allocation6], 16  }
  0x58   :  { %1253 = vsyncadd [#allocation6], 4294967280 }
  0x59   :  { %1254 = dma.done.wait [#allocation5], 1536  }
  0x5a   :  { %1255 = vsyncadd [#allocation5], 4294965760 }
  0x5b   :  { %1256 = dma.done.wait [#allocation9], 544  }
  0x5c   :  { %1257 = vsyncadd [#allocation9], 4294966752 }
  0x5d   :  { %1258 = dma.done.wait [#allocation12], 16  }
  0x5e   :  { %1259 = vsyncadd [#allocation12], 4294967280 }
  0x5f   :  { %133 = sfence }
  0x60   :  { %s1631_s24 = sld [smem:[#allocation17_spill]]  ;;  %vm140_vm0 = vcmask 254976   ;;  %v1080_v7 = vld [vmem:[#allocation7 + $0x4] ss:$16 sps:$4 sm:$0xff]   ;;  %v1082_v8 = vld [vmem:[#allocation7] ss:$16 sps:$4 sm:$0xff]   ;;  %v175_v44 = vstv %s1608_s6 }
  0x61   :  { %v1083_v9 = vld [vmem:[#allocation7 + $0x24] ss:$16 sps:$4 sm:$0xff]   ;;  %311 = vmatprep.subr.bf16.mxu0 %v1080_v7  ;;  %v1085_v10 = vld [vmem:[#allocation7 + $0x20] ss:$16 sps:$4 sm:$0xff]   ;;  %v1091_v16 = vld [vmem:[#allocation7 + $0xc] ss:$16 sps:$4 sm:$0xff]  }
  0x62   :  { %312 = vmatpush1.bf16.msra.mxu0 %v1082_v8  ;;  %v1086_v14 = vld [vmem:[#allocation7 + $0x44] ss:$16 sps:$4 sm:$0xff]   ;;  %v1088_v15 = vld [vmem:[#allocation7 + $0x40] ss:$16 sps:$4 sm:$0xff]   ;;  %s1632_s9 = sld [smem:[#allocation18_spill]]  ;;  %v1269_v20 = vmov 0  }
  0x63   :  { %313 = vmatprep.subr.bf16.mxu0 %v1083_v9  ;;  %v1089_v18 = vld [vmem:[#allocation7 + $0x8] ss:$16 sps:$4 sm:$0xff]   ;;  %343 = vmatprep.mubr.bf16.mxu0 %v1269_v20  ;;  %vm307_vm1 = vcmask 392192   ;;  %v944_v22 = vld [vmem:[%s1609_s7] ss:$0 sm:$0xff]  ;;  %s1270_s7 = smov 3  }
  0x64   :  { %523 = vmatprep.mubr.bf16.mxu1 %v1269_v20  ;;  %v1094_v24 = vld [vmem:[#allocation7 + $0x2c] ss:$16 sps:$4 sm:$0xff]   ;;  %v945_v25 = vld [vmem:[%s1610_s8] ss:$0 sm:$0xff]  ;;  %v1092_v26 = vld [vmem:[#allocation7 + $0x28] ss:$16 sps:$4 sm:$0xff]  }
  0x65   :  { %v1097_v29 = vld [vmem:[#allocation7 + $0x4c] ss:$16 sps:$4 sm:$0xff]   ;;  %v1095_v30 = vld [vmem:[#allocation7 + $0x48] ss:$16 sps:$4 sm:$0xff]   ;;  %s1271_s27 = smov 1   ;;  %s1272_s8 = smov 2  }
  0x66   :  { %v1443_v0 = vld [vmem:[%s1631_s24] sm:$0x3]  ;;  %314 = vmatpush1.bf16.msra.mxu0 %v1085_v10  ;;  %v1100_v31 = vld [vmem:[%s1613_s11 + $0x4] ss:$8 sps:$4 sm:$0xff]   ;;  %v1103_v33 = vld [vmem:[%s1613_s11 + $0x14] ss:$8 sps:$4 sm:$0xff]  }
  0x67   :  { %v141_v1 = vsel %vm140_vm0, %v1443_v0, 0.0  ;;  %315 = vmatprep.subr.bf16.mxu0 %v1086_v14  ;;  %v1098_v32 = vld [vmem:[%s1613_s11] ss:$8 sps:$4 sm:$0xff]   ;;  %v1101_v34 = vld [vmem:[%s1613_s11 + $0x10] ss:$8 sps:$4 sm:$0xff]   ;;  %v393_v35 = vpack.c.bf16 %v1443_v0, %v1443_v0  ;;  %vm418_vm2 = vcmask 261120   ;;  %v227_v14 = vlaneseq }
  0x68   :  { %142 = vadd.xlane.f32.xlu0 %v141_v1  ;;  %v136_v17 = vld [vmem:[%s1632_s9] sm:$0x3]  ;;  %v1104_v36 = vld [vmem:[#allocation8 + $0x4] ss:$8 sps:$4 sm:$0xff]   ;;  %v1107_v38 = vld [vmem:[#allocation8 + $0x14] ss:$8 sps:$4 sm:$0xff]  }
  0x69   :  { %v212_v19 = vpack.c.bf16 %v136_v17, %v136_v17  ;;  %v1106_v37 = vld [vmem:[#allocation8] ss:$8 sps:$4 sm:$0xff]   ;;  %491 = vmatprep.subr.bf16.mxu1 %v1104_v36  ;;  %v1109_v39 = vld [vmem:[#allocation8 + $0x10] ss:$8 sps:$4 sm:$0xff]   ;;  %s946_s12 = sld [smem:[#allocation4 + $0x3]]  ;;  %s947_s25 = sld [smem:[#allocation4 + $0x2]] }
  0x6a   :  { %316 = vmatpush1.bf16.msra.mxu0 %v1088_v15  ;;  %492 = vmatpush1.bf16.msra.mxu1 %v1106_v37  ;;  %s948_s24 = sld [smem:[#allocation4 + $0x1]]  ;;  %s201_s11 = sld [smem:[#allocation4]]  ;;  %vm181_vm3 = vcmask 7168   ;;  %vm199_vm4 = vcmask 23552   ;;  %vm190_vm5 = vcmask 15360   ;;  %v1110_v10 = vld [vmem:[%s1615_s13] sm:$0xff]  }
  0x6b   :  { %352 = vmatprep.subr.bf16.mxu0 %v1091_v16  ;;  %493 = vmatprep.subr.bf16.mxu1 %v1107_v38  ;;  %vm1274_vm6 = vmmov 0   ;;  %v1501_v15 = vshrl.u32 %v227_v14, 7  ;;  %v225_v17 = vld [vmem:[%s1612_s10] sm:$0xf]  ;;  %s1633_s3 = sld [smem:[#allocation21_spill]]  ;;  %s1634_s22 = sld [smem:[#allocation20_spill]] }
  0x6c   :  { %s1635_s1 = sld [smem:[#allocation19_spill]]  ;;  %s1275_s18 = smov 80   ;;  %v1122_v14 = vld [vmem:[%s1621_s19] sm:$0xff]   ;;  %vm918_vm7 = vcmask 654336   ;;  %vm932_vm8 = vcmask 1041408   ;;  %vm933_vm9 = vcmask 781314  }
  0x6d   :  { %962 = vmatmul.mubr.msk.bf16.vlgmr.msra.gmra.mrb[0].mxu0 %vm307_vm1, %v212_v19  ;;  %v233_v16 = vsub.s32 1, %v1501_v15  ;;  %s1276_s29 = smov 32   ;;  %vm934_vm10 = vmor %vm933_vm9, %vm932_vm8 }
  0x6e   :  { %353 = vmatpush1.bf16.msra.mxu0 %v1089_v18  ;;  %384 = vmatprep.mubr.bf16.mxu0 %v1269_v20 }
  0x6f   :  { %354 = vmatprep.subr.bf16.mxu0 %v1094_v24  ;;  %494 = vmatpush1.bf16.msra.mxu1 %v1109_v39  ;;  %v173_v40 = vstv %s946_s12  ;;  %v184_v41 = vstv %s947_s25  ;;  %v234_v18 = vrot.slane %v225_v17, %v233_v16  ;;  %s1277_s12 = smov 48  }
  0x70   :  { %v193_v48 = vstv %s948_s24  ;;  %v202_v51 = vstv %s201_s11 }
  0x72   :  { %355 = vmatpush1.bf16.msra.mxu0 %v1092_v26 }
  0x73   :  { %356 = vmatprep.subr.bf16.mxu0 %v1097_v29 }
  0x76   :  { %357 = vmatpush1.bf16.msra.mxu0 %v1095_v30 }
  0x77   :  { %422 = vmatprep.subr.bf16.mxu0 %v1100_v31  ;;  %v139_v31 = vld [vmem:[%s1633_s3] sm:$0x3] }
  0x79   :  { %963 = vmatmul.mubr.msk.bf16.vlgmr.msra.gmra.mrb[4].mxu0 %vm307_vm1, %v212_v19  ;;  %v237_v19 = vsub.s32 2, %v1501_v15 }
  0x7a   :  { %423 = vmatpush1.bf16.msra.mxu0 %v1098_v32  ;;  %454 = vmatprep.mubr.bf16.mxu0 %v1269_v20 }
  0x7b   :  { %424 = vmatprep.subr.bf16.mxu0 %v1103_v33 }
  0x7e   :  { %425 = vmatpush1.bf16.msra.mxu0 %v1101_v34 }
  0x81   :  { %968 = vmatmul.mubr.msk.bf16.vlgmr.msra.gmra.mrb[0].mxu0 %vm418_vm2, %v393_v35 }
  0xf5   :  { %v143_v2 = vpop.xlane.xlu0 %142 }
  0xf6   :  { %v145_v3 = vmul.f32 0.03125, %v143_v2 }
  0xf8   :  { %v146_v4 = vsub.f32 %v1443_v0, %v145_v3 }
  0xfa   :  { %v147_v5 = vmul.f32 %v146_v4, %v146_v4 }
  0xfc   :  { %v148_v6 = vsel %vm140_vm0, %v147_v5, 0.0 }
  0xfd   :  { %149 = vadd.xlane.f32.xlu0 %v148_v6 }
 0x14c   :  { %v386_v2 = vpop.f32.mrb[4].mxu0 }
 0x14d   :  { %v388_v3 = vpop.f32.mrb[5].mxu0 }
 0x18a   :  { %v150_v11 = vpop.xlane.xlu0 %149 }
 0x18b   :  { %v151_v12 = vmul.f32 0.03125, %v150_v11  ;;  %v1273_v11 = vmov 0.0  }
 0x18c   :  { %1015 = vmatprep.subr.bf16.mxu0 %v1273_v11  ;;  %1025 = vmatprep.subr.bf16.mxu1 %v1273_v11 }
 0x18d   :  { %v152_v13 = vadd.f32 1e-05, %v151_v12  ;;  %1016 = vmatpush3.bf16.msra.mxu0 %v1110_v10  ;;  %v1111_v12 = vld [vmem:[%s1615_s13 + $0x8] sm:$0xff]   ;;  %1021 = vmatprep.mubr.msk.bf16.mxu0 %vm1274_vm6, %v1273_v11 }
 0x18e   :  { %1017 = vmatprep.subr.bf16.mxu0 %v1273_v11 }
 0x18f   :  { %1130 = vrsqrt.f32 %v152_v13  ;;  %v1112_v13 = vld [vmem:[%s1615_s13 + $0x10] sm:$0xff]  }
 0x191   :  { %1018 = vmatpush3.bf16.msra.mxu0 %v1111_v12 }
 0x192   :  { %1019 = vmatprep.subr.bf16.mxu0 %v1273_v11 }
 0x195   :  { %1020 = vmatpush3.bf16.msra.mxu0 %v1112_v13 }
 0x199   :  { %v1131_v21 = vpop.eup %1130 }
 0x19a   :  { %v154_v23 = vmul.f32 %v1131_v21, %v146_v4  ;;  %v390_v4 = vpop.f32.mrb[6].mxu0  ;;  %v241_v21 = vsub.s32 3, %v1501_v15 }
 0x19b   :  { %v391_v5 = vpop.f32.mrb[7].mxu0 }
 0x19c   :  { %v162_v27 = vmul.f32 %v944_v22, %v154_v23  ;;  %v456_v6 = vpop.f32.mrb[0].mxu0  ;;  %v238_v23 = vrot.slane %v225_v17, %v237_v19  ;;  %v242_v24 = vrot.slane %v225_v17, %v241_v21 }
 0x19d   :  { %v458_v7 = vpop.f32.mrb[1].mxu0 }
 0x19e   :  { %v170_v28 = vadd.f32 %v945_v25, %v162_v27  ;;  %v460_v8 = vpop.f32.mrb[2].mxu0  ;;  %v1056_v22 = vadd.f32 %v458_v7, %v234_v18  ;;  %v387_v26 = vadd.f32 %v386_v2, %v238_v23  ;;  %v389_v27 = vadd.f32 %v388_v3, %v242_v24 }
 0x19f   :  { %v461_v9 = vpop.f32.mrb[3].mxu0  ;;  %v1113_v8 = vld [vmem:[%s1619_s17] ss:$8 sps:$4 sm:$0xff]  }
 0x1a0   :  { %196 = vrot.lane.b32.xlu0 %v170_v28, %s1270_s7  ;;  %178 = vrot.lane.b32.xlu1 %v170_v28, %s1271_s27  ;;  %v174_v43 = vmul.f32 %v173_v40, %v170_v28  ;;  %v974_v25 = vmul.f32 -1.442695, %v1056_v22  ;;  %v1118_v9 = vld [vmem:[%s1619_s17 + $0x14] ss:$8 sps:$4 sm:$0xff]  }
 0x1a2   :  { %v176_v49 = vadd.f32 %v175_v44, %v174_v43 }
 0x1a4   :  { %187 = vrot.lane.b32.xlu1 %v170_v28, %s1272_s8  ;;  %v229_v28 = vsub.s32 0, %v1501_v15 }
 0x1a6   :  { %v230_v35 = vrot.slane %v225_v17, %v229_v28  ;;  %v1123_v17 = vld [vmem:[%s1621_s19 + $0x8] sm:$0xff]  }
 0x1a8   :  { %v1055_v39 = vadd.f32 %v456_v6, %v230_v35  ;;  %v1126_v35 = vld [vmem:[%s1621_s19 + $0x20] sm:$0xff]  }
 0x212   :  { %v179_v42 = vpop.permute.xlu1 %178  ;;  %v197_v46 = vpop.permute.xlu0 %196 }
 0x213   :  { %v182_v45 = vsel %vm181_vm3, 0.0, %v179_v42  ;;  %v200_v52 = vsel %vm199_vm4, 0.0, %v197_v46 }
 0x214   :  { %v185_v47 = vmul.f32 %v184_v41, %v182_v45  ;;  %v203_v56 = vmul.f32 %v202_v51, %v200_v52 }
 0x216   :  { %v188_v50 = vpop.permute.xlu1 %187  ;;  %v186_v54 = vadd.f32 %v185_v47, %v176_v49  ;;  %v138_v47 = vld [vmem:[%s1634_s22] sm:$0x3] }
 0x217   :  { %v191_v53 = vsel %vm190_vm5, 0.0, %v188_v50 }
 0x218   :  { %v194_v55 = vmul.f32 %v193_v48, %v191_v53  ;;  %v137_v48 = vld [vmem:[%s1635_s1] sm:$0x3] }
 0x21a   :  { %v195_v57 = vadd.f32 %v194_v55, %v186_v54 }
 0x21c   :  { %v204_v58 = vadd.f32 %v203_v56, %v195_v57 }
 0x21e   :  { %v949_v59 = vmul.f32 -1.442695, %v204_v58 }
 0x220   :  { %1132 = vpow2.f32 %v949_v59 }
 0x22a   :  { %v1133_v60 = vpop.eup %1132 }
 0x22b   :  { %v208_v61 = vadd.f32 1.0, %v1133_v60 }
 0x22d   :  { %1134 = vrcp.f32 %v208_v61 }
 0x22e   :  { %1136 = vpow2.f32 %v974_v25 }
 0x22f   :  { %1138 = vtanh.f32 %v1055_v39  ;;  %v700_v39 = vld [vmem:[#allocation10] sm:$0x3] }
 0x237   :  { %v1135_v62 = vpop.eup %1134 }
 0x238   :  { %v211_v63 = vmul.f32 %v1135_v62, %v204_v58  ;;  %v1137_v42 = vpop.eup %1136  ;;  %v625_v62 = vstv %s1616_s14 }
 0x239   :  { %v536_v45 = vadd.f32 1.0, %v1137_v42  ;;  %v1139_v46 = vpop.eup %1138 }
 0x23a   :  { %v463_v1 = vpack.c.bf16 %v211_v63, %v211_v63 }
 0x23c   :  { %973 = vmatmul.mubr.msk.bf16.vlgmr.msra.gmra.mrb[0].mxu1 %vm418_vm2, %v463_v1 }
 0x23d   :  { %1026 = vmatpush3.bf16.msra.mxu1 %v1110_v10  ;;  %1031 = vmatprep.mubr.msk.bf16.mxu1 %vm1274_vm6, %v1273_v11  ;;  %v1116_v10 = vld [vmem:[%s1619_s17 + $0x10] ss:$8 sps:$4 sm:$0xff]  }
 0x23e   :  { %1027 = vmatprep.subr.bf16.mxu1 %v1273_v11 }
 0x241   :  { %1028 = vmatpush3.bf16.msra.mxu1 %v1111_v12  ;;  %v1121_v12 = vld [vmem:[%s1619_s17 + $0x24] ss:$8 sps:$4 sm:$0xff]  }
 0x242   :  { %1029 = vmatprep.subr.bf16.mxu1 %v1273_v11 }
 0x245   :  { %1030 = vmatpush3.bf16.msra.mxu1 %v1112_v13  ;;  %v1119_v13 = vld [vmem:[%s1619_s17 + $0x20] ss:$8 sps:$4 sm:$0xff]  }
 0x246   :  { %1035 = vmatprep.subr.bf16.mxu1 %v1273_v11 }
 0x30f   :  { %v525_v29 = vpop.f32.mrb[0].mxu1 }
 0x310   :  { %v526_v30 = vadd.f32 %v525_v29, %v387_v26  ;;  %v527_v32 = vpop.f32.mrb[1].mxu1  ;;  %v980_v26 = vld [vmem:[%s1617_s15] ss:$0 sm:$0xff] }
 0x311   :  { %v528_v33 = vadd.f32 %v527_v32, %v389_v27  ;;  %v529_v34 = vpop.f32.mrb[2].mxu1  ;;  %v981_v29 = vld [vmem:[%s1618_s16] ss:$0 sm:$0xff] }
 0x312   :  { %v530_v36 = vpop.f32.mrb[3].mxu1  ;;  %v1125_v34 = vld [vmem:[%s1621_s19 + $0x18] sm:$0xff]  }
 0x313   :  { %v539_v37 = vadd.f32 %v528_v33, %v139_v31  ;;  %v1124_v33 = vld [vmem:[%s1621_s19 + $0x10] sm:$0xff]   ;;  %v1127_v36 = vld [vmem:[%s1621_s19 + $0x28] sm:$0xff]  }
 0x315   :  { %v540_v38 = vmax.f32 %v539_v37, %v526_v30 }
 0x317   :  { %v541_v40 = vsub.f32 %v526_v30, %v540_v38  ;;  %v544_v41 = vsub.f32 %v539_v37, %v540_v38  ;;  %v1128_v37 = vld [vmem:[%s1621_s19 + $0x30] sm:$0xff]  }
 0x319   :  { %v542_v43 = vmul.f32 1.442695, %v541_v40  ;;  %v545_v44 = vmul.f32 1.442695, %v544_v41  ;;  %v709_v40 = vrot.slane %v700_v39, %v233_v16 }
 0x31b   :  { %1140 = vpow2.f32 %v542_v43 }
 0x31c   :  { %1142 = vpow2.f32 %v545_v44 }
 0x31d   :  { %1144 = vrcp.f32 %v536_v45 }
 0x325   :  { %v1141_v49 = vpop.eup %1140 }
 0x326   :  { %v1143_v50 = vpop.eup %1142  ;;  %v548_v51 = vmul.f32 %v1141_v49, %v1139_v46 }
 0x327   :  { %v550_v52 = vmul.f32 %v1143_v50, %v138_v47  ;;  %v547_v53 = vmul.f32 %v1143_v50, %v137_v48  ;;  %v1145_v56 = vpop.eup %1144  ;;  %v705_v47 = vrot.slane %v700_v39, %v229_v28 }
 0x329   :  { %v549_v54 = vadd.f32 %v548_v51, %v547_v53  ;;  %v1523_v55 = vadd.f32 %v1141_v49, %v550_v52 }
 0x32b   :  { %910 = vrot.lane.b32.xlu1 %v549_v54, %s1275_s18  ;;  %v552_v57 = vmul.f32 %v1145_v56, %v549_v54  ;;  %v553_v58 = vadd.f32 1e-06, %v1523_v55  ;;  %v1278_v56 = vmov 1983009808  }
 0x32d   :  { %1146 = vrcp.f32 %v553_v58  ;;  %v989_v58 = vld [vmem:[#allocation11] ss:$0 sm:$0xff] }
 0x337   :  { %v1147_v59 = vpop.eup %1146 }
 0x338   :  { %v555_v60 = vmul.f32 %v1147_v59, %v552_v57  ;;  %v925_v57 = vunpack.c.l.s4 %v1278_v56 }
 0x33a   :  { %906 = vrot.lane.b32.xlu1 %v555_v60, %s1276_s29  ;;  %v563_v61 = vpack.c.bf16 %v555_v60, %v555_v60 }
 0x33c   :  { %1022 = vmatmul.mubr.msk.bf16.vlgmr.msra.gmra.mrb[8].mxu0 %vm307_vm1, %v563_v61  ;;  %v926_v61 = vunpack.c.0.s8 %v925_v57 }
 0x33d   :  { %777 = vmatprep.mubr.bf16.mxu0 %v1269_v20  ;;  %v1115_v20 = vld [vmem:[%s1619_s17 + $0x4] ss:$8 sps:$4 sm:$0xff]  }
 0x33e   :  { %914 = vrot.lane.b32.xlu1 %v540_v38, %s1277_s12  ;;  %745 = vmatprep.subr.bf16.mxu0 %v1115_v20  ;;  %v1129_v38 = vld [vmem:[%s1621_s19 + $0x38] sm:$0xff]  }
 0x33f   :  { %746 = vmatpush1.bf16.msra.mxu0 %v1113_v8 }
 0x340   :  { %747 = vmatprep.subr.bf16.mxu0 %v1118_v9 }
 0x343   :  { %748 = vmatpush1.bf16.msra.mxu0 %v1116_v10 }
 0x344   :  { %749 = vmatprep.subr.bf16.mxu0 %v1121_v12 }
 0x347   :  { %750 = vmatpush1.bf16.msra.mxu0 %v1119_v13 }
 0x39d   :  { %v911_v54 = vpop.permute.xlu1 %910 }
 0x3ac   :  { %v907_v16 = vpop.permute.xlu1 %906 }
 0x40f   :  { %v619_v63 = vpop.f32.mrb[8].mxu0 }
 0x410   :  { %v626_v1 = vmul.f32 %v625_v62, %v619_v63  ;;  %v1023_v2 = vpop.f32.mrb[9].mxu0 }
 0x411   :  { %v622_v3 = vpop.f32.mrb[10].mxu0 }
 0x412   :  { %v627_v4 = vsub.f32 %v555_v60, %v626_v1  ;;  %v1024_v5 = vpop.f32.mrb[11].mxu0  ;;  %v915_v1 = vpop.permute.xlu1 %914 }
 0x413   :  { %v920_v5 = vsel %vm307_vm1, %v1523_v55, %v915_v1 }
 0x414   :  { %v628_v6 = vmul.f32 %v627_v4, %v627_v4 }
 0x416   :  { %v629_v7 = vpack.c.bf16 %v628_v6, %v628_v6 }
 0x418   :  { %1032 = vmatmul.mubr.msk.bf16.vlgmr.msra.gmra.mrb[4].mxu1 %vm307_vm1, %v629_v7 }
 0x419   :  { %1051 = vmatprep.mubr.msk.bf16.mxu1 %vm1274_vm6, %v1273_v11  ;;  %1036 = vmatpush3.bf16.msra.mxu1 %v1122_v14 }
 0x41a   :  { %1037 = vmatprep.subr.bf16.mxu1 %v1273_v11 }
 0x41d   :  { %1038 = vmatpush3.bf16.msra.mxu1 %v1123_v17 }
 0x41e   :  { %1039 = vmatprep.subr.bf16.mxu1 %v1273_v11 }
 0x421   :  { %1040 = vmatpush3.bf16.msra.mxu1 %v1124_v33 }
 0x422   :  { %1041 = vmatprep.subr.bf16.mxu1 %v1273_v11 }
 0x425   :  { %1042 = vmatpush3.bf16.msra.mxu1 %v1125_v34 }
 0x426   :  { %1043 = vmatprep.subr.bf16.mxu1 %v1273_v11 }
 0x429   :  { %1044 = vmatpush3.bf16.msra.mxu1 %v1126_v35 }
 0x42a   :  { %1045 = vmatprep.subr.bf16.mxu1 %v1273_v11 }
 0x42d   :  { %1046 = vmatpush3.bf16.msra.mxu1 %v1127_v36 }
 0x42e   :  { %1047 = vmatprep.subr.bf16.mxu1 %v1273_v11 }
 0x431   :  { %1048 = vmatpush3.bf16.msra.mxu1 %v1128_v37 }
 0x432   :  { %1049 = vmatprep.subr.bf16.mxu1 %v1273_v11 }
 0x435   :  { %1050 = vmatpush3.bf16.msra.mxu1 %v1129_v38 }
 0x4eb   :  { %v667_v18 = vpop.f32.mrb[4].mxu1 }
 0x4ec   :  { %v673_v19 = vmul.f32 %v667_v18, %v625_v62  ;;  %v1033_v21 = vpop.f32.mrb[5].mxu1 }
 0x4ed   :  { %v670_v22 = vpop.f32.mrb[6].mxu1 }
 0x4ee   :  { %v674_v23 = vadd.f32 1e-05, %v673_v19  ;;  %v1034_v24 = vpop.f32.mrb[7].mxu1 }
 0x4f0   :  { %1148 = vrsqrt.f32 %v674_v23 }
 0x4fa   :  { %v1149_v25 = vpop.eup %1148 }
 0x4fb   :  { %v676_v27 = vmul.f32 %v1149_v25, %v627_v4  ;;  %v929_v4 = vsub.s32 %v926_v61, %v1501_v15 }
 0x4fd   :  { %v684_v30 = vmul.f32 %v980_v26, %v676_v27 }
 0x4ff   :  { %v692_v31 = vadd.f32 %v981_v29, %v684_v30 }
 0x501   :  { %v693_v32 = vpack.c.bf16 %v692_v31, %v692_v31 }
 0x503   :  { %988 = vmatmul.mubr.msk.bf16.vlgmr.msra.gmra.mrb[12].mxu0 %vm307_vm1, %v693_v32 }
 0x5d6   :  { %v779_v41 = vpop.f32.mrb[12].mxu0 }
 0x5d7   :  { %v781_v42 = vpop.f32.mrb[13].mxu0  ;;  %v780_v50 = vadd.f32 %v779_v41, %v705_v47 }
 0x5d8   :  { %v782_v43 = vadd.f32 %v781_v42, %v709_v40  ;;  %v783_v44 = vpop.f32.mrb[14].mxu0 }
 0x5d9   :  { %v784_v45 = vpop.f32.mrb[15].mxu0 }
 0x5da   :  { %v787_v46 = vmul.f32 0.70710677, %v782_v43  ;;  %v786_v48 = vmul.f32 0.5, %v782_v43 }
 0x5dc   :  { %1150 = verf.f32 %v787_v46 }
 0x5e6   :  { %v1151_v11 = vpop.eup %1150 }
 0x5e7   :  { %v789_v49 = vadd.f32 1.0, %v1151_v11 }
 0x5e9   :  { %v790_v51 = vmul.f32 %v789_v49, %v786_v48 }
 0x5eb   :  { %v791_v52 = vmul.f32 %v790_v51, %v780_v50 }
 0x5ed   :  { %v792_v53 = vpack.c.bf16 %v791_v52, %v791_v52 }
 0x5ef   :  { %1052 = vmatmul.mubr.bf16.vlgmr.msra.gmra.mrb[8].mxu1 %v792_v53 }
 0x6c2   :  { %v898_v59 = vpop.f32.mrb[8].mxu1 }
 0x6c3   :  { %v899_v60 = vadd.f32 %v989_v58, %v898_v59  ;;  %v1053_v62 = vpop.f32.mrb[9].mxu1 }
 0x6c4   :  { %v901_v63 = vpop.f32.mrb[10].mxu1 }
 0x6c5   :  { %v904_v28 = vadd.f32 %v899_v60, %v1443_v0  ;;  %v1054_v2 = vpop.f32.mrb[11].mxu1 }
 0x6c7   :  { %v917_v3 = vsel %vm418_vm2, %v904_v28, %v907_v16 }
 0x6c8   :  { %v919_v6 = vsel %vm918_vm7, %v917_v3, %v911_v54 }
 0x6c9   :  { %v923_v7 = vcombine.low %v919_v6, %v920_v5 }
 0x6cb   :  { %v930_v20 = vrot.slane %v923_v7, %v929_v4 }
 0x6cd   :  { %935 = vst.msk [vmem:[%s1623_s21] sm:$0xf] %vm934_vm10, %v930_v20 }
 0x6ce   :  { %940 = vsyncpa [#allocation5], 1 }
 0x6cf   :  { %941 = vsyncpa [#allocation9], 1 }
 0x6d0   :  { %942 = vsyncpa [#allocation12], 1 }
 0x6d1   :  { %943 = vsyncpa [#allocation6], 1 }

</bundles_post_ra>
